<compile_context>
chip_gen: v5e
topology: v5e:2x2
jax: 0.10.0
libtpu: 0.0.40
codegen_flags: <defaults>
</compile_context>

<pallas_src>
import functools

import jax
import jax.numpy as jnp
from jax.experimental import pallas as pl
from jax.experimental.pallas import tpu as pltpu


LANE = 128


# ------------------------------- kernel -------------------------------------

def _frozen_diff_kernel(n_diff, L, Lp, x_ref, out_ref):
    """x_ref: (TN, Lp) f32, out_ref: (TN, (n_diff + 1) * Lp) f32.

    Lp is L rounded up to a multiple of 128; lanes >= L of x_ref are zero.
    """
    x = x_ref[...]                                        # (TN, Lp)
    tn = x.shape[0]
    lane = jax.lax.broadcasted_iota(jnp.int32, (tn, Lp), dimension=1)

    # channel 0: identity (lane-dense, 128-aligned store)
    out_ref[:, 0:Lp] = x

    cur = x
    for d in range(1, n_diff + 1):                        # static unrolled loop
        # left shift by one lane: roll(x, Lp-1) == roll(x, -1) -> nxt[i] = cur[i+1]
        # (single XLU op; the wrapped-around last lane is killed by the mask)
        nxt = pltpu.roll(cur, Lp - 1, 1)
        # forward difference (frozen conv1d kernel [-1, 1]) fused with the
        # trailing zero padding of F.pad(x_diff, (0, d)); also keeps the
        # Lp > L padding region at zero for all higher-order diffs.
        cur = jnp.where(lane < (L - d), nxt - cur, 0.0)
        out_ref[:, d * Lp:(d + 1) * Lp] = cur             # lane-dense store


# ----------------------------- tile selection --------------------------------

def _pick_tile_n(N, Lp, out_cols, vmem_budget=20 * 1024 * 1024):
    """Largest batch tile that divides N and keeps the double-buffered working
    set (input + output blocks, f32) under `vmem_budget`.  Budget is sized for
    v7x's 64 MiB physical / 32 MiB scoped VMEM; plenty of headroom on v5e/v6e.
    """
    bytes_per_row = 4 * (Lp + out_cols) * 2               # f32, 2x buffered
    max_rows = max(8, vmem_budget // bytes_per_row)
    for t in (1024, 512, 256, 128, 64, 32, 16, 8):
        if t <= max_rows and N % t == 0:
            return t
    return N                                              # tiny N: one full block


# ------------------------------- wrapper -------------------------------------

def frozen_diff_conv_forward(x, n_diff=1):
    """x: (N, 1, L) float32 -> (N, n_diff + 1, L) float32 (or None)."""
    N, C, L = x.shape
    assert C == 1, "frozen_diff_conv expects a single input channel"
    if n_diff >= L:
        # matches the PyTorch module's early-exit behaviour
        print("Too many derivatives. Returning None.\n")
        return None

    # pad the lane axis to a multiple of 128 so every store is lane-dense
    Lp = max(LANE, pl.cdiv(L, LANE) * LANE)
    x2 = x.reshape(N, L)                                  # drop size-1 channel dim
    if Lp != L:
        x2 = jnp.pad(x2, ((0, 0), (0, Lp - L)))

    n_ch = n_diff + 1
    out_cols = n_ch * Lp
    TN = _pick_tile_n(N, Lp, out_cols)
    grid = (N // TN,)

    kernel = functools.partial(_frozen_diff_kernel, n_diff, L, Lp)
    out_flat = pl.pallas_call(
        kernel,
        out_shape=jax.ShapeDtypeStruct((N, out_cols), x.dtype),
        grid=grid,
        in_specs=[pl.BlockSpec((TN, Lp), lambda i: (i, 0))],
        out_specs=pl.BlockSpec((TN, out_cols), lambda i: (i, 0)),
        compiler_params=pltpu.CompilerParams(
            dimension_semantics=("parallel",),            # megacore on v7x
            vmem_limit_bytes=32 * 1024 * 1024,            # above v5e's 16 MiB default
        ),
        cost_estimate=pl.CostEstimate(
            flops=2 * n_diff * N * L,
            transcendentals=0,
            bytes_accessed=(n_diff + 2) * N * L * 4,
        ),
    )(x2)

    # free metadata reshape: per-row layout is [ch0 | ch1 | ... | chn] x Lp
    out = out_flat.reshape(N, n_ch, Lp)
    if Lp != L:
        out = out[:, :, :L]                               # drop lane padding
    return out


# ------------------------------ reference ------------------------------------

def reference(x, n_diff):
    """Pure-JAX reference matching the PyTorch forward exactly."""
    cur = x[:, 0, :]                                      # (N, L)
    chans = [cur]
    d_cur = cur
    for d in range(1, n_diff + 1):
        d_cur = d_cur[:, 1:] - d_cur[:, :-1]              # conv1d([-1, 1]), valid
        chans.append(jnp.pad(d_cur, ((0, 0), (0, d))))
    return jnp.stack(chans, axis=1)                       # (N, n_diff + 1, L)


# --------------------------------- main ---------------------------------------

if __name__ == "__main__":
    N, L, n_diff = 4, 16, 3

    key = jax.random.PRNGKey(0)
    x = jax.random.normal(key, (N, 1, L), jnp.float32)

    out = frozen_diff_conv_forward(x, n_diff)
    out = jax.block_until_ready(out)

    ref = reference(x, n_diff)
    assert out is not None
    assert out.shape == (N, n_diff + 1, L)
    assert jnp.allclose(out, ref, atol=1e-6, rtol=1e-6), \
        "Pallas kernel mismatch vs JAX reference"

    print("KERNEL_OK")
</pallas_src>

<mosaic_0001>
module attributes {stable_mosaic.version = 11 : i64} {
  func.func @_frozen_diff_kernel(%arg0: i32, %arg1: memref<4x128xf32, #tpu.memory_space<vmem>>, %arg2: memref<4x512xf32, #tpu.memory_space<vmem>>) attributes {dimension_semantics = [#tpu.dimension_semantics<parallel>], iteration_bounds = array<i64: 1>, scalar_prefetch = 0 : i64, scratch_operands = 0 : i64, tpu.core_type = #tpu.core_type<tc>, window_params = [{transform_indices = @transform_0, window_bounds = array<i64: 4, 128>}, {transform_indices = @transform_1, window_bounds = array<i64: 4, 512>}]} {
    %c0 = arith.constant 0 : index
    %c0_0 = arith.constant 0 : index
    %0 = vector.load %arg1[%c0, %c0_0] : memref<4x128xf32, #tpu.memory_space<vmem>>, vector<4x128xf32>
    %1 = tpu.iota {dimensions = array<i32: 1>} : vector<4x128xi32>
    %c0_1 = arith.constant 0 : index
    %c0_2 = arith.constant 0 : index
    %2 = vector.load %arg2[%c0_1, %c0_2] : memref<4x512xf32, #tpu.memory_space<vmem>>, vector<4x128xf32>
    tpu.vector_store %arg2[%c0_1, %c0_2], %0 {strides = array<i32>} : memref<4x512xf32, #tpu.memory_space<vmem>>, vector<4x128xf32>,
    %c127_i32 = arith.constant 127 : i32
    %3 = tpu.dynamic_rotate %0 by %c127_i32 dim 1 : vector<4x128xf32>, i32 -> vector<4x128xf32>
    %c15_i32 = arith.constant 15 : i32
    %4 = vector.broadcast %c15_i32 : i32 to vector<4x128xi32>
    %5 = arith.cmpi slt, %1, %4 : vector<4x128xi32>
    %6 = arith.subf %3, %0 : vector<4x128xf32>
    %cst = arith.constant 0.000000e+00 : f32
    %7 = vector.broadcast %cst : f32 to vector<4x128xf32>
    %8 = arith.select %5, %6, %7 : vector<4x128xi1>, vector<4x128xf32>
    %c0_3 = arith.constant 0 : index
    %c128 = arith.constant 128 : index
    %9 = vector.load %arg2[%c0_3, %c128] : memref<4x512xf32, #tpu.memory_space<vmem>>, vector<4x128xf32>
    tpu.vector_store %arg2[%c0_3, %c128], %8 {strides = array<i32>} : memref<4x512xf32, #tpu.memory_space<vmem>>, vector<4x128xf32>,
    %c127_i32_4 = arith.constant 127 : i32
    %10 = tpu.dynamic_rotate %8 by %c127_i32_4 dim 1 : vector<4x128xf32>, i32 -> vector<4x128xf32>
    %c14_i32 = arith.constant 14 : i32
    %11 = vector.broadcast %c14_i32 : i32 to vector<4x128xi32>
    %12 = arith.cmpi slt, %1, %11 : vector<4x128xi32>
    %13 = arith.subf %10, %8 : vector<4x128xf32>
    %cst_5 = arith.constant 0.000000e+00 : f32
    %14 = vector.broadcast %cst_5 : f32 to vector<4x128xf32>
    %15 = arith.select %12, %13, %14 : vector<4x128xi1>, vector<4x128xf32>
    %c0_6 = arith.constant 0 : index
    %c256 = arith.constant 256 : index
    %16 = vector.load %arg2[%c0_6, %c256] : memref<4x512xf32, #tpu.memory_space<vmem>>, vector<4x128xf32>
    tpu.vector_store %arg2[%c0_6, %c256], %15 {strides = array<i32>} : memref<4x512xf32, #tpu.memory_space<vmem>>, vector<4x128xf32>,
    %c127_i32_7 = arith.constant 127 : i32
    %17 = tpu.dynamic_rotate %15 by %c127_i32_7 dim 1 : vector<4x128xf32>, i32 -> vector<4x128xf32>
    %c13_i32 = arith.constant 13 : i32
    %18 = vector.broadcast %c13_i32 : i32 to vector<4x128xi32>
    %19 = arith.cmpi slt, %1, %18 : vector<4x128xi32>
    %20 = arith.subf %17, %15 : vector<4x128xf32>
    %cst_8 = arith.constant 0.000000e+00 : f32
    %21 = vector.broadcast %cst_8 : f32 to vector<4x128xf32>
    %22 = arith.select %19, %20, %21 : vector<4x128xi1>, vector<4x128xf32>
    %c0_9 = arith.constant 0 : index
    %c384 = arith.constant 384 : index
    %23 = vector.load %arg2[%c0_9, %c384] : memref<4x512xf32, #tpu.memory_space<vmem>>, vector<4x128xf32>
    tpu.vector_store %arg2[%c0_9, %c384], %22 {strides = array<i32>} : memref<4x512xf32, #tpu.memory_space<vmem>>, vector<4x128xf32>,
    return
  }
  func.func @transform_0(%arg0: i32) -> (i32, i32) {
    %c0_i32 = arith.constant 0 : i32
    %c0_i32_0 = arith.constant 0 : i32
    return %arg0, %c0_i32 : i32, i32
  }
  func.func @transform_1(%arg0: i32) -> (i32, i32) {
    %c0_i32 = arith.constant 0 : i32
    %c0_i32_0 = arith.constant 0 : i32
    return %arg0, %c0_i32 : i32, i32
  }
}

</mosaic_0001>

<bundles_post_ra>
// kernel: tpu_custom_call.1
= control target key start
LH: loop header
LB: loop body
LE: loop exit
PB: predicated region body
PF: predicated region fallthrough
CT: control target
= control target key end

     0   :  { %6 = vsyncpa [#allocation3], 0  ;;  %s136_s0 = inlined_call_operand.hbm [shape: f32[4,128], index: 0, kind: input, shape index: {}]   ;;  %s137_s1 = inlined_call_operand.hbm [shape: f32[4,512], index: 1, kind: output, shape index: {}]  }
   0x1   :  { %7 = vsyncpa [#allocation4], 0  ;;  %s13_s8 = sshll.u32 %s136_s0, 4  ;;  %s117_s9 = smov [#allocation2]   ;;  %s14_s8 = int_to_ptr.hbm [resolvable:$true] %s13_s8 }
   0x2   :  { %s15_s10 = sshll.u32 %s117_s9, 4  ;;  %s16_s10 = int_to_ptr.vmem [resolvable:$true] %s15_s10 }
   0x3   :  { %18 = dma.hbm_to_vmem [thread:$0]  %s14_s8, 64, %s16_s10, [#allocation3]  }
   0x4   :  { %113 = dma.done.wait [#allocation3], 64  }
   0x5   :  { %114 = vsyncadd [#allocation3], 4294967232  ;;  %v23_v0 = vld [vmem:[#allocation2] sm:$0xf]  ;;  %s118_s11 = smov 127   ;;  %v24_v1 = vlaneseq  ;;  %s119_s0 = smov [#allocation5]  }
   0x6   :  { %27 = vrot.lane.b32.xlu0 %v23_v0, %s118_s11  ;;  %26 = vst [vmem:[#allocation5] sm:$0xf] %v23_v0  ;;  %s50_s12 = sshll.u32 %s119_s0, 4  ;;  %s52_s15 = sshll.u32 %s137_s1, 4  ;;  %s51_s12 = int_to_ptr.vmem [resolvable:$true] %s50_s12  ;;  %s53_s15 = int_to_ptr.hbm [resolvable:$true] %s52_s15 }
   0x7   :  { %v25_v2 = vand.u32 127, %v24_v1 }
   0x9   :  { %vm29_vm0 = vcmp.lt.s32.totalorder %v25_v2, 15  ;;  %vm35_vm1 = vcmp.lt.s32.totalorder %v25_v2, 14  ;;  %vm41_vm2 = vcmp.lt.s32.totalorder %v25_v2, 13 }
  0x78   :  { %v28_v3 = vpop.permute.xlu0 %27 }
  0x79   :  { %v30_v4 = vsub.f32 %v28_v3, %v23_v0 }
  0x7b   :  { %v31_v5 = vsel %vm29_vm0, %v30_v4, 0.0 }
  0x7c   :  { %33 = vrot.lane.b32.xlu0 %v31_v5, %s118_s11  ;;  %32 = vst [vmem:[#allocation5 + $0x4] sm:$0xf] %v31_v5 }
  0xee   :  { %v34_v6 = vpop.permute.xlu0 %33 }
  0xef   :  { %v36_v7 = vsub.f32 %v34_v6, %v31_v5 }
  0xf1   :  { %v37_v8 = vsel %vm35_vm1, %v36_v7, 0.0 }
  0xf2   :  { %39 = vrot.lane.b32.xlu1 %v37_v8, %s118_s11  ;;  %38 = vst [vmem:[#allocation5 + $0x8] sm:$0xf] %v37_v8 }
 0x164   :  { %v40_v9 = vpop.permute.xlu1 %39 }
 0x165   :  { %v42_v10 = vsub.f32 %v40_v9, %v37_v8 }
 0x167   :  { %v43_v11 = vsel %vm41_vm2, %v42_v10, 0.0 }
 0x168   :  { %44 = vst [vmem:[#allocation5 + $0xc] sm:$0xf] %v43_v11 }
 0x169   :  { %55 = dma.vmem_to_hbm [thread:$0]  %s51_s12, 256, %s53_s15, [#allocation4]  }
 0x16a   :  { %115 = dma.done.wait [#allocation4], 256  }
 0x16b   :  { %116 = vsyncadd [#allocation4], 4294967040 }
 0x16c   :  { %60 = vsyncpa [#allocation3], 1 }
 0x16d   :  { %61 = vsyncpa [#allocation4], 1 }

</bundles_post_ra>
